<compile_context>
chip_gen: v7x
topology: tpu7x:2x2x1
jax: 0.10.0
libtpu: 0.0.40
codegen_flags: <defaults>
</compile_context>

<pallas_src>
import functools

import jax
import jax.numpy as jnp
from jax.experimental import pallas as pl
from jax.experimental.pallas import tpu as pltpu

# ~2 MiB of x (f32-equivalent) per grid block: reaches the ~85% HBM-roofline
# plateau; double-buffered in/out tiles + f32 temporaries stay well inside the
# 32 MiB scoped-VMEM limit requested below on v5e / v6e / v7x.
_MAX_TILE_ELEMS = 512 * 1024
_VMEM_LIMIT_BYTES = 32 * 1024 * 1024


def _round_up(a: int, b: int) -> int:
    return (a + b - 1) // b * b


def _rms_norm_kernel(x_ref, g_ref, o_ref, *, dim: int, eps: float):
    """Plain path: normalize a (TR, D) slab of independent rows (f32 math)."""
    x = x_ref[...].astype(jnp.float32)                      # (TR, D)
    g = g_ref[...].astype(jnp.float32)                      # (1, D)
    sumsq = jnp.sum(x * x, axis=-1, keepdims=True)          # (TR, 1)
    inv_norm = jax.lax.rsqrt(sumsq) * (dim ** 0.5)          # EUP rsqrt
    inv_norm = jnp.minimum(inv_norm, 1.0 / eps)             # clamp(norm, eps)
    o_ref[...] = (x * inv_norm * g).astype(o_ref.dtype)


def _rms_norm_packed_kernel(x_ref, g_ref, m_ref, o_ref, *, dim: int, eps: float):
    """Lane-packed path (D < 128): k = 128 // D rows per 128-lane-dense row.

    Per-original-row sums of squares are a segmented reduction, computed as a
    matmul with a (128, 128) block-diagonal ones matrix on the otherwise-idle
    MXU; each lane of the result already carries its own row's sum.
    """
    x = x_ref[...].astype(jnp.float32)                      # (TR, 128)
    g = g_ref[...].astype(jnp.float32)                      # (1, 128)
    seg = jnp.dot(x * x, m_ref[...],
                  preferred_element_type=jnp.float32)       # (TR, 128)
    inv_norm = jax.lax.rsqrt(seg) * (dim ** 0.5)
    inv_norm = jnp.minimum(inv_norm, 1.0 / eps)
    o_ref[...] = (x * inv_norm * g).astype(o_ref.dtype)


def _choose_block_rows(n_rows: int, width: int) -> int:
    """Row-tile size: budget-sized, multiple of 8, >=4 grid steps when big."""
    if n_rows * width <= _MAX_TILE_ELEMS:
        return n_rows                        # single block == full row extent
    tr = max(8, (_MAX_TILE_ELEMS // max(width, 1)) // 8 * 8)
    # Keep >= 4 grid steps so v7x can shard rows across both TensorCores.
    tr = min(tr, _round_up(pl.cdiv(n_rows, 4), 8))
    return max(8, tr)


def rms_norm(x, g, *, eps: float = 1e-8):
    """RMSNorm over the last dim of x. x: (..., D), g: (D,)."""
    orig_shape = x.shape
    D = orig_shape[-1]
    R = 1
    for s in orig_shape[:-1]:
        R *= s
    x2 = x.reshape(R, D)
    itemsize = jnp.dtype(x2.dtype).itemsize

    # Lane-pack small feature dims: k rows per 128-lane-dense row.
    k = 128 // D if (0 < D < 128 and 128 % D == 0) else 1
    packed = (k > 1) and (R % k == 0)

    if packed:
        n_rows, width = R // k, k * D
        x_in = x2.reshape(n_rows, width)         # free row-major reshape
        g_in = jnp.tile(g, (k,)).reshape(1, width)
        seg_ids = jnp.arange(width, dtype=jnp.int32) // D
        ones_bd = (seg_ids[:, None] == seg_ids[None, :]).astype(jnp.float32)
        extra_inputs = (ones_bd,)
        extra_specs = [pl.BlockSpec((width, width), lambda i: (0, 0))]
        kernel = functools.partial(_rms_norm_packed_kernel, dim=D, eps=eps)
    else:
        n_rows, width = R, D
        x_in = x2
        g_in = g.reshape(1, D)
        extra_inputs = ()
        extra_specs = []
        kernel = functools.partial(_rms_norm_kernel, dim=D, eps=eps)

    tr = _choose_block_rows(n_rows, width)
    grid = (pl.cdiv(n_rows, tr),)   # partial last block is masked by Pallas

    cost = pl.CostEstimate(
        flops=4 * R * D,
        transcendentals=R,
        bytes_accessed=(2 * R * D + D) * itemsize,
    )

    out = pl.pallas_call(
        kernel,
        out_shape=jax.ShapeDtypeStruct((n_rows, width), x2.dtype),
        grid=grid,
        in_specs=[
            pl.BlockSpec((tr, width), lambda i: (i, 0)),   # row slab of x
            pl.BlockSpec((1, width), lambda i: (0, 0)),    # gain (tiny, shared)
            *extra_specs,                                  # block-diag ones (packed)
        ],
        out_specs=pl.BlockSpec((tr, width), lambda i: (i, 0)),
        compiler_params=pltpu.CompilerParams(
            dimension_semantics=("parallel",),
            vmem_limit_bytes=_VMEM_LIMIT_BYTES,
        ),
        cost_estimate=cost,
    )(x_in, g_in, *extra_inputs)

    return out.reshape(orig_shape)


def rms_norm_ref(x, g, eps=1e-8):
    """Pure-JAX reference matching the torch module exactly."""
    dim = x.shape[-1]
    norm = jnp.sqrt(jnp.sum(x * x, axis=-1, keepdims=True)) * (dim ** -0.5)
    return x / jnp.maximum(norm, eps) * g


if __name__ == "__main__":
    key = jax.random.PRNGKey(0)
    kx, kg, kx2 = jax.random.split(key, 3)

    # Module-implied shape: batch=2, seq=8, dim=32 (exercises the packed path).
    B, N, D = 2, 8, 32
    x = jax.random.normal(kx, (B, N, D), dtype=jnp.float32)
    g = jnp.ones((D,), jnp.float32) + 0.1 * jax.random.normal(kg, (D,), jnp.float32)

    out = jax.block_until_ready(rms_norm(x, g))
    ref = rms_norm_ref(x, g)
    assert out.shape == (B, N, D), out.shape
    assert bool(jnp.all(jnp.isfinite(out)))
    assert bool(jnp.allclose(out, ref, rtol=1e-5, atol=1e-5)), (
        float(jnp.max(jnp.abs(out - ref))))

    # Second small check on the plain (non-packed) path: D >= 128, odd row count.
    B2, N2, D2 = 3, 5, 160
    x2 = jax.random.normal(kx2, (B2, N2, D2), dtype=jnp.float32)
    g2 = jnp.ones((D2,), jnp.float32)
    out2 = jax.block_until_ready(rms_norm(x2, g2))
    ref2 = rms_norm_ref(x2, g2)
    assert bool(jnp.allclose(out2, ref2, rtol=1e-5, atol=1e-5)), (
        float(jnp.max(jnp.abs(out2 - ref2))))

    print("KERNEL_OK")
</pallas_src>

<mosaic_0001>
module attributes {stable_mosaic.version = 11 : i64} {
  func.func @_rms_norm_packed_kernel(%arg0: i32, %arg1: memref<4x128xf32, #tpu.memory_space<vmem>>, %arg2: memref<1x128xf32, #tpu.memory_space<vmem>>, %arg3: memref<128x128xf32, #tpu.memory_space<vmem>>, %arg4: memref<4x128xf32, #tpu.memory_space<vmem>>) attributes {dimension_semantics = [#tpu.dimension_semantics<parallel>], iteration_bounds = array<i64: 1>, scalar_prefetch = 0 : i64, scratch_operands = 0 : i64, tpu.core_type = #tpu.core_type<tc>, window_params = [{transform_indices = @transform_0, window_bounds = array<i64: 4, 128>}, {pipeline_mode = #tpu.pipeline_mode<synchronous>, transform_indices = @transform_1, window_bounds = array<i64: 1, 128>}, {pipeline_mode = #tpu.pipeline_mode<synchronous>, transform_indices = @transform_2, window_bounds = array<i64: 128, 128>}, {transform_indices = @transform_3, window_bounds = array<i64: 4, 128>}]} {
    %c0 = arith.constant 0 : index
    %c0_0 = arith.constant 0 : index
    %0 = vector.load %arg1[%c0, %c0_0] : memref<4x128xf32, #tpu.memory_space<vmem>>, vector<4x128xf32>
    %c0_1 = arith.constant 0 : index
    %c0_2 = arith.constant 0 : index
    %1 = vector.load %arg2[%c0_1, %c0_2] : memref<1x128xf32, #tpu.memory_space<vmem>>, vector<1x128xf32>
    %2 = arith.mulf %0, %0 : vector<4x128xf32>
    %c0_3 = arith.constant 0 : index
    %c0_4 = arith.constant 0 : index
    %3 = vector.load %arg3[%c0_3, %c0_4] : memref<128x128xf32, #tpu.memory_space<vmem>>, vector<128x128xf32>
    %cst = arith.constant dense<0.000000e+00> : vector<4x128xf32>
    %4 = tpu.matmul %2, %3, %cst {dimension_numbers = #tpu.dot_dimension_numbers<[1], [0], [0], [1], [0, 0, 1, 1], [], []>} : vector<4x128xf32>, vector<128x128xf32>, vector<4x128xf32> -> vector<4x128xf32>
    %5 = math.rsqrt %4 : vector<4x128xf32>
    %cst_5 = arith.constant 5.65685415 : f32
    %6 = vector.broadcast %cst_5 : f32 to vector<4x128xf32>
    %7 = arith.mulf %5, %6 : vector<4x128xf32>
    %cst_6 = arith.constant 1.000000e+08 : f32
    %8 = vector.broadcast %cst_6 : f32 to vector<4x128xf32>
    %9 = arith.minimumf %7, %8 : vector<4x128xf32>
    %10 = arith.mulf %0, %9 : vector<4x128xf32>
    %11 = vector.broadcast %1 : vector<1x128xf32> to vector<4x128xf32>
    %12 = arith.mulf %10, %11 : vector<4x128xf32>
    %c0_7 = arith.constant 0 : index
    %c0_8 = arith.constant 0 : index
    %13 = vector.load %arg4[%c0_7, %c0_8] : memref<4x128xf32, #tpu.memory_space<vmem>>, vector<4x128xf32>
    tpu.vector_store %arg4[%c0_7, %c0_8], %12 {strides = array<i32>} : memref<4x128xf32, #tpu.memory_space<vmem>>, vector<4x128xf32>,
    return
  }
  func.func @transform_0(%arg0: i32) -> (i32, i32) {
    %c0_i32 = arith.constant 0 : i32
    %c0_i32_0 = arith.constant 0 : i32
    return %arg0, %c0_i32 : i32, i32
  }
  func.func @transform_1(%arg0: i32) -> (i32, i32) {
    %c0_i32 = arith.constant 0 : i32
    %c0_i32_0 = arith.constant 0 : i32
    %c0_i32_1 = arith.constant 0 : i32
    return %c0_i32, %c0_i32_0 : i32, i32
  }
  func.func @transform_2(%arg0: i32) -> (i32, i32) {
    %c0_i32 = arith.constant 0 : i32
    %c0_i32_0 = arith.constant 0 : i32
    %c0_i32_1 = arith.constant 0 : i32
    return %c0_i32, %c0_i32_0 : i32, i32
  }
  func.func @transform_3(%arg0: i32) -> (i32, i32) {
    %c0_i32 = arith.constant 0 : i32
    %c0_i32_0 = arith.constant 0 : i32
    return %arg0, %c0_i32 : i32, i32
  }
}

</mosaic_0001>

<bundles_post_ra>
// kernel: tpu_custom_call.1
= control target key start
LH: loop header
LB: loop body
LE: loop exit
PB: predicated region body
PF: predicated region fallthrough
CT: control target
= control target key end

     0   :  { %8 = vsyncpa [#allocation3], 0  ;;  %s391_s0 = inlined_call_operand.hbm [shape: f32[4,128], index: 0, kind: input, shape index: {}]   ;;  %s392_s1 = inlined_call_operand.vmem [shape: f32[1,128], index: 1, kind: input, shape index: {}]   ;;  %s393_s2 = inlined_call_operand.hbm [shape: f32[128,128], index: 2, kind: input, shape index: {}]   ;;  %s394_s3 = inlined_call_operand.hbm [shape: f32[4,128], index: 3, kind: output, shape index: {}]  }
   0x1   :  { %9 = vsyncpa [#allocation6], 0 }
   0x2   :  { %10 = vsyncpa [#allocation4], 0  ;;  %s317_s12 = smov [#allocation2]   ;;  %s318_s14 = smov [#allocation5]  }
   0x3   :  { %s17_s13 = sshll.u32 %s317_s12, 4  ;;  %s28_s15 = sshll.u32 %s318_s14, 4  ;;  %s18_s13 = int_to_ptr.vmem [resolvable:$true] %s17_s13  ;;  %s345_s15 = int_to_ptr.vmem [resolvable:$true] %s28_s15 }
   0x4   :  { %s245_s18 = scalar_lea.hbm %s391_s0, 64 }
   0x5   :  { %p246_p0 = scmp.ne.s32.totalorder %s391_s0, %s245_s18  ;;  %p249_p1 = scmp.lt.u32.totalorder %s245_s18, %s391_s0 }
   0x7   :  { %p251_p2 = pnand %p249_p1, %p246_p0 }
   0x9   :  { %254 = shalt.err (!%p251_p2)
}
   0xa   :  { %s255_s23 = scalar_lea.vmem %s18_s13, 64  ;;  %p260_p4 = scmp.lt.s32.totalorder %s18_s13, %s18_s13 }
   0xb   :  { %p256_p3 = scmp.ne.s32.totalorder %s18_s13, %s255_s23  ;;  %p261_p5 = scmp.lt.s32.totalorder %s255_s23, %s255_s23 }
   0xd   :  { %p262_p6 = por %p261_p5, %p260_p4 }
   0xf   :  { %p263_p7 = pnand %p262_p6, %p256_p3 }
  0x11   :  { %266 = shalt.err (!%p263_p7)
}
  0x12   :  { %20 = dma.hbm_to_vmem [thread:$0]  %s391_s0, 64, %s18_s13, [#allocation3]  }
  0x13   :  { %s267_s28 = scalar_lea.hbm %s393_s2, 2048 }
  0x14   :  { %p268_p8 = scmp.ne.s32.totalorder %s393_s2, %s267_s28  ;;  %p271_p9 = scmp.lt.u32.totalorder %s267_s28, %s393_s2 }
  0x16   :  { %p273_p10 = pnand %p271_p9, %p268_p8 }
  0x18   :  { %276 = shalt.err (!%p273_p10)
}
  0x19   :  { %s277_s6 = scalar_lea.vmem %s345_s15, 2048  ;;  %p282_p12 = scmp.lt.s32.totalorder %s345_s15, %s345_s15 }
  0x1a   :  { %p278_p11 = scmp.ne.s32.totalorder %s345_s15, %s277_s6  ;;  %p283_p13 = scmp.lt.s32.totalorder %s277_s6, %s277_s6 }
  0x1c   :  { %p284_p0 = por %p283_p13, %p282_p12 }
  0x1e   :  { %p285_p1 = pnand %p284_p0, %p278_p11 }
  0x20   :  { %288 = shalt.err (!%p285_p1)
}
  0x21   :  { %s319_s0 = smov 128   ;;  %s320_s7 = smov 8  }
  0x22   :  { %34 = dma.hbm_to_vmem [thread:$0]  %s393_s2, 2048, %s345_s15, [#allocation6], %s319_s0, %s319_s0, %s320_s7  }
  0x23   :  { %311 = dma.done.wait [#allocation3], 64  }
  0x24   :  { %312 = vsyncadd [#allocation3], 4294967232 }
  0x25   :  { %313 = dma.done.wait [#allocation6], 2048  }
  0x26   :  { %314 = vsyncadd [#allocation6], 4294965248  ;;  %v321_v0 = vmov 0.0|0.0   ;;  %vm322_vm0 = vmmov 0   ;;  %v323_v1 = vmov 0.0   ;;  %v44_v2 = vld [vmem:[#allocation5] sm:$0xff] }
  0x27   :  { %211 = vmatprep.subr.bf16.mxu0 %v321_v0  ;;  %208 = vmatprep.mubr.msk.f32.mxu0 %vm322_vm0, %v323_v1  ;;  %v45_v3 = vld [vmem:[#allocation5 + $0x8] sm:$0xff]  ;;  %v46_v4 = vld [vmem:[#allocation5 + $0x10] sm:$0xff]  ;;  %v47_v6 = vld [vmem:[#allocation5 + $0x18] sm:$0xff]  ;;  %s324_s11 = smov [#allocation7]  }
  0x28   :  { %v212_v5 = vpack.c.bf16 %v45_v3, %v44_v2  ;;  %v215_v7 = vpack.c.bf16 %v47_v6, %v46_v4  ;;  %v48_v8 = vld [vmem:[#allocation5 + $0x20] sm:$0xff]  ;;  %v49_v9 = vld [vmem:[#allocation5 + $0x28] sm:$0xff]  ;;  %v50_v11 = vld [vmem:[#allocation5 + $0x30] sm:$0xff]  ;;  %s148_s12 = sshll.u32 %s324_s11, 4  ;;  %s149_s12 = int_to_ptr.vmem [resolvable:$true] %s148_s12 }
  0x29   :  { %v218_v10 = vpack.c.bf16 %v49_v9, %v48_v8  ;;  %v51_v12 = vld [vmem:[#allocation5 + $0x38] sm:$0xff]  ;;  %v52_v14 = vld [vmem:[#allocation5 + $0x40] sm:$0xff]  ;;  %v53_v15 = vld [vmem:[#allocation5 + $0x48] sm:$0xff]  ;;  %s289_s13 = scalar_lea.vmem %s149_s12, 64  ;;  %p294_p3 = scmp.lt.s32.totalorder %s149_s12, %s149_s12 }
  0x2a   :  { %213 = vmatpush3.bf16.msra.mxu0 %v212_v5  ;;  %v221_v13 = vpack.c.bf16 %v51_v12, %v50_v11  ;;  %v224_v16 = vpack.c.bf16 %v53_v15, %v52_v14  ;;  %v54_v17 = vld [vmem:[#allocation5 + $0x50] sm:$0xff]  ;;  %v55_v18 = vld [vmem:[#allocation5 + $0x58] sm:$0xff]  ;;  %v56_v20 = vld [vmem:[#allocation5 + $0x60] sm:$0xff]  ;;  %p290_p2 = scmp.ne.s32.totalorder %s149_s12, %s289_s13  ;;  %p295_p4 = scmp.lt.s32.totalorder %s289_s13, %s289_s13 }
  0x2b   :  { %214 = vmatprep.subr.bf16.mxu0 %v321_v0  ;;  %v227_v19 = vpack.c.bf16 %v55_v18, %v54_v17  ;;  %v57_v21 = vld [vmem:[#allocation5 + $0x68] sm:$0xff]  ;;  %v58_v23 = vld [vmem:[#allocation5 + $0x70] sm:$0xff]  ;;  %v59_v24 = vld [vmem:[#allocation5 + $0x78] sm:$0xff] }
  0x2c   :  { %v230_v22 = vpack.c.bf16 %v57_v21, %v56_v20  ;;  %v233_v25 = vpack.c.bf16 %v59_v24, %v58_v23  ;;  %v41_v26 = vld [vmem:[#allocation2] sm:$0xf]  ;;  %p296_p5 = por %p295_p4, %p294_p3 }
  0x2d   :  { %v43_v27 = vmul.f32 %v41_v26, %v41_v26  ;;  %v158_v33 = vld [vmem:[%s392_s1] ss:$0 sm:$0xff] }
  0x2e   :  { %216 = vmatpush3.bf16.msra.mxu0 %v215_v7  ;;  %p297_p6 = pnand %p296_p5, %p290_p2 }
  0x2f   :  { %217 = vmatprep.subr.bf16.mxu0 %v321_v0 }
  0x32   :  { %219 = vmatpush3.bf16.msra.mxu0 %v218_v10 }
  0x33   :  { %220 = vmatprep.subr.bf16.mxu0 %v321_v0 }
  0x36   :  { %222 = vmatpush3.bf16.msra.mxu0 %v221_v13 }
  0x37   :  { %223 = vmatprep.subr.bf16.mxu0 %v321_v0 }
  0x3a   :  { %225 = vmatpush3.bf16.msra.mxu0 %v224_v16 }
  0x3b   :  { %226 = vmatprep.subr.bf16.mxu0 %v321_v0 }
  0x3e   :  { %228 = vmatpush3.bf16.msra.mxu0 %v227_v19 }
  0x3f   :  { %229 = vmatprep.subr.bf16.mxu0 %v321_v0 }
  0x42   :  { %231 = vmatpush3.bf16.msra.mxu0 %v230_v22 }
  0x43   :  { %232 = vmatprep.subr.bf16.mxu0 %v321_v0 }
  0x46   :  { %234 = vmatpush3.bf16.msra.mxu0 %v233_v25 }
  0x49   :  { %209 = vmatmul.mubr.f32.vlgmr.msra.gmra.mrb[0].mxu0 %v43_v27 }
 0x11c   :  { %v126_v28 = vpop.f32.mrb[0].mxu0 }
 0x11d   :  { %243 = vrsqrt.f32 %v126_v28  ;;  %v210_v29 = vpop.f32.mrb[1].mxu0 }
 0x127   :  { %v244_v30 = vpop.eup %243 }
 0x128   :  { %v131_v31 = vmul.f32 5.656854, %v244_v30 }
 0x12a   :  { %v132_v32 = vmin.f32 %v131_v31, 1e+08 }
 0x12c   :  { %v133_v34 = vmul.f32 %v132_v32, %v41_v26 }
 0x12e   :  { %v140_v35 = vmul.f32 %v158_v33, %v133_v34 }
 0x130   :  { %141 = vst [vmem:[#allocation7] sm:$0xf] %v140_v35 }
 0x131   :  { %300 = shalt.err (!%p297_p6)
}
 0x132   :  { %s301_s16 = scalar_lea.hbm %s394_s3, 64 }
 0x133   :  { %p302_p7 = scmp.ne.s32.totalorder %s394_s3, %s301_s16  ;;  %p305_p8 = scmp.lt.u32.totalorder %s301_s16, %s394_s3 }
 0x135   :  { %p307_p9 = pnand %p305_p8, %p302_p7 }
 0x137   :  { %310 = shalt.err (!%p307_p9)
}
 0x138   :  { %151 = dma.vmem_to_hbm [thread:$0]  %s149_s12, 64, %s394_s3, [#allocation4]  }
 0x139   :  { %315 = dma.done.wait [#allocation4], 64  }
 0x13a   :  { %316 = vsyncadd [#allocation4], 4294967232 }
 0x13b   :  { %155 = vsyncpa [#allocation3], 1 }
 0x13c   :  { %156 = vsyncpa [#allocation6], 1 }
 0x13d   :  { %157 = vsyncpa [#allocation4], 1 }

</bundles_post_ra>
